<compile_context>
chip_gen: v7x
topology: tpu7x:2x2x1
jax: 0.10.0
libtpu: 0.0.40
codegen_flags: <defaults>
</compile_context>

<pallas_src>
import functools
import math

import jax
import jax.numpy as jnp
from jax.experimental import pallas as pl
from jax.experimental.pallas import tpu as pltpu


def make_positional_encoding_table(d_model: int, max_len: int = 5000) -> jnp.ndarray:
    """Sinusoidal table exactly as the PyTorch __init__ computes it.

    Returned as a dense 2-D [max_len, d_model] float32 array (the module's
    registered buffer is [max_len, 1, d_model]; the singleton batch dim is a
    pure broadcast axis and is dropped here for a lane-dense layout)."""
    position = jnp.arange(0, max_len, dtype=jnp.float32)[:, None]            # [max_len, 1]
    div_term = jnp.exp(
        jnp.arange(0, d_model, 2, dtype=jnp.float32) * (-math.log(10000.0) / d_model)
    )                                                                         # [d_model/2]
    angles = position * div_term                                              # [max_len, d_model/2]
    pe = jnp.zeros((max_len, d_model), dtype=jnp.float32)
    pe = pe.at[:, 0::2].set(jnp.sin(angles))
    pe = pe.at[:, 1::2].set(jnp.cos(angles))
    return pe                                                                 # [max_len, d_model]


def _pos_enc_kernel(x_ref, pe_ref, o_ref, *, nb: int):
    # x_ref: (ts, nb*D)   pe_ref: (ts, D)   o_ref: (ts, nb*D)
    pe = pe_ref[...].astype(jnp.float32)          # (ts, D)
    pe_bd = jnp.tile(pe, (1, nb))                 # (ts, nb*D): one copy per batch in block
    o_ref[...] = (x_ref[...].astype(jnp.float32) + pe_bd).astype(o_ref.dtype)


def _round_up(n: int, m: int) -> int:
    return ((n + m - 1) // m) * m


def positional_encoding_forward(x: jnp.ndarray, pe: jnp.ndarray,
                                *, donate_x: bool = False,
                                target_block_bytes: int = 2 << 20,
                                vmem_budget_bytes: int = 24 << 20) -> jnp.ndarray:
    """x: [seq_len, batch, d_model]; pe: [max_len, d_model] (max_len >= seq_len)."""
    S, B, D = x.shape
    assert pe.ndim == 2 and pe.shape[1] == D and pe.shape[0] >= S
    itemsize = jnp.dtype(x.dtype).itemsize

    # --- Column (batch-group) tile.  Only split the batch axis when the
    # resulting lane width nb*D stays 128-aligned; otherwise use the full
    # B*D width (always legal: full array dim).
    nb = B
    if D % 128 == 0 and B > 1:
        nb_cap = max(1, target_block_bytes // (8 * D * itemsize))
        nb = max(1, min(B, int(nb_cap)))
    ct = pl.cdiv(B, nb)

    # --- Sequence tile from byte budgets (multiple of 8 rows).
    x_row_bytes = nb * D * itemsize
    # Resident per sequence row across the pipeline:
    #   double-buffered x input + double-buffered output + double-buffered pe.
    per_row_resident = 4 * x_row_bytes + 2 * D * 4
    ts = min(target_block_bytes // max(x_row_bytes, 1),
             vmem_budget_bytes // max(per_row_resident, 1))
    ts = max(8, int(ts))
    if ct == 1 and S > 8:
        # Keep >= 2 grid steps so both v7x TensorCores get work.
        ts = min(ts, _round_up(pl.cdiv(S, 2), 8))
    ts = min(ts, _round_up(S, 8))
    ts = max(8, (ts // 8) * 8)
    st = pl.cdiv(S, ts)

    BD = B * D
    x2 = x.reshape(S, BD)  # free contiguous view; lane-dense when B*D % 128 == 0

    out_bytes = S * BD * itemsize
    cost = pl.CostEstimate(flops=S * BD, transcendentals=0,
                           bytes_accessed=2 * out_bytes + S * D * 4)

    out2 = pl.pallas_call(
        functools.partial(_pos_enc_kernel, nb=nb),
        out_shape=jax.ShapeDtypeStruct((S, BD), x.dtype),
        grid_spec=pltpu.PrefetchScalarGridSpec(
            num_scalar_prefetch=0,
            grid=(st, ct),
            in_specs=[
                pl.BlockSpec((ts, nb * D), lambda i, j: (i, j)),
                # Full pe table passed; the grid only touches seq blocks
                # 0..ceil(S/ts)-1, so no wrapper-side pe[:S] slice/copy.
                pl.BlockSpec((ts, D), lambda i, j: (i, 0)),
            ],
            out_specs=pl.BlockSpec((ts, nb * D), lambda i, j: (i, j)),
        ),
        compiler_params=pltpu.CompilerParams(
            dimension_semantics=("parallel", "parallel"),
            vmem_limit_bytes=32 << 20,
        ),
        cost_estimate=cost,
        input_output_aliases=({0: 0} if donate_x else {}),
    )(x2, pe)

    return out2.reshape(S, B, D)


if __name__ == "__main__":
    # 1) Small shapes consistent with the module's forward: [seq, batch, d_model].
    seq_len, batch, d_model = 8, 2, 32
    max_len = 64  # module default is 5000; smaller table keeps the example tiny

    key = jax.random.PRNGKey(0)
    x = jax.random.normal(key, (seq_len, batch, d_model), dtype=jnp.float32)
    pe = make_positional_encoding_table(d_model, max_len)          # [max_len, d_model]

    out = jax.block_until_ready(positional_encoding_forward(x, pe))
    ref = x + pe[:seq_len][:, None, :]   # eval-mode dropout == identity
    assert out.shape == (seq_len, batch, d_model)
    assert jnp.allclose(out, ref, atol=1e-6), "kernel output mismatch"

    # 2) Ragged sequence length (cdiv grid + partial last seq block; 2 grid
    #    steps so both v7x TensorCores are used).
    seq_len2 = 20
    x2 = jax.random.normal(jax.random.PRNGKey(1), (seq_len2, batch, d_model),
                           dtype=jnp.float32)
    out2 = jax.block_until_ready(positional_encoding_forward(x2, pe))
    ref2 = x2 + pe[:seq_len2][:, None, :]
    assert out2.shape == (seq_len2, batch, d_model)
    assert jnp.allclose(out2, ref2, atol=1e-6), "kernel output mismatch (ragged)"

    # 3) Lane-dense bf16 path (B*D % 128 == 0), f32 add + bf16 cast in-kernel.
    S3, B3, D3 = 64, 4, 256
    pe3 = make_positional_encoding_table(D3, 128)
    x3 = jax.random.normal(jax.random.PRNGKey(2), (S3, B3, D3)).astype(jnp.bfloat16)
    out3 = jax.block_until_ready(positional_encoding_forward(x3, pe3))
    ref3 = (x3.astype(jnp.float32) + pe3[:S3][:, None, :]).astype(jnp.bfloat16)
    assert out3.shape == (S3, B3, D3)
    assert jnp.allclose(out3.astype(jnp.float32), ref3.astype(jnp.float32),
                        atol=1e-2, rtol=1e-2), "kernel output mismatch (bf16)"

    # 4) Batch-group (column) tiling path with a partial last batch block,
    #    forced via a tiny block budget.
    S4, B4, D4 = 16, 6, 128
    pe4 = make_positional_encoding_table(D4, 32)
    x4 = jax.random.normal(jax.random.PRNGKey(3), (S4, B4, D4), dtype=jnp.float32)
    out4 = jax.block_until_ready(
        positional_encoding_forward(x4, pe4, target_block_bytes=16 << 10))
    ref4 = x4 + pe4[:S4][:, None, :]
    assert out4.shape == (S4, B4, D4)
    assert jnp.allclose(out4, ref4, atol=1e-6), "kernel output mismatch (col-tiled)"

    print("KERNEL_OK")
</pallas_src>

<mosaic_0001>
module attributes {stable_mosaic.version = 11 : i64} {
  func.func @_pos_enc_kernel(%arg0: i32, %arg1: i32, %arg2: memref<8x64xf32, #tpu.memory_space<vmem>>, %arg3: memref<8x32xf32, #tpu.memory_space<vmem>>, %arg4: memref<8x64xf32, #tpu.memory_space<vmem>>) attributes {dimension_semantics = [#tpu.dimension_semantics<parallel>, #tpu.dimension_semantics<parallel>], iteration_bounds = array<i64: 1, 1>, scalar_prefetch = 0 : i64, scratch_operands = 0 : i64, tpu.core_type = #tpu.core_type<tc>, window_params = [{transform_indices = @transform_0, window_bounds = array<i64: 8, 64>}, {transform_indices = @transform_1, window_bounds = array<i64: 8, 32>}, {transform_indices = @transform_2, window_bounds = array<i64: 8, 64>}]} {
    %c0 = arith.constant 0 : index
    %c0_0 = arith.constant 0 : index
    %0 = vector.load %arg3[%c0, %c0_0] : memref<8x32xf32, #tpu.memory_space<vmem>>, vector<8x32xf32>
    %1 = tpu.concatenate %0, %0 in 1 : vector<8x32xf32>, vector<8x32xf32> -> vector<8x64xf32>
    %c0_1 = arith.constant 0 : index
    %c0_2 = arith.constant 0 : index
    %2 = vector.load %arg2[%c0_1, %c0_2] : memref<8x64xf32, #tpu.memory_space<vmem>>, vector<8x64xf32>
    %3 = arith.addf %2, %1 : vector<8x64xf32>
    %c0_3 = arith.constant 0 : index
    %c0_4 = arith.constant 0 : index
    %4 = vector.load %arg4[%c0_3, %c0_4] : memref<8x64xf32, #tpu.memory_space<vmem>>, vector<8x64xf32>
    tpu.vector_store %arg4[%c0_3, %c0_4], %3 {strides = array<i32>} : memref<8x64xf32, #tpu.memory_space<vmem>>, vector<8x64xf32>,
    return
  }
  func.func @transform_0(%arg0: i32, %arg1: i32) -> (i32, i32) {
    %c0_i32 = arith.constant 0 : i32
    return %arg0, %arg1 : i32, i32
  }
  func.func @transform_1(%arg0: i32, %arg1: i32) -> (i32, i32) {
    %c0_i32 = arith.constant 0 : i32
    %c0_i32_0 = arith.constant 0 : i32
    return %arg0, %c0_i32 : i32, i32
  }
  func.func @transform_2(%arg0: i32, %arg1: i32) -> (i32, i32) {
    %c0_i32 = arith.constant 0 : i32
    return %arg0, %arg1 : i32, i32
  }
}

</mosaic_0001>

<bundles_post_ra>
// kernel: tpu_custom_call.1
= control target key start
LH: loop header
LB: loop body
LE: loop exit
PB: predicated region body
PF: predicated region fallthrough
CT: control target
= control target key end

     0   :  { %s98_s0 = inlined_call_operand.vmem [shape: f32[8,64], index: 0, kind: input, shape index: {}]   ;;  %s99_s1 = inlined_call_operand.vmem [shape: f32[64,32], index: 1, kind: input, shape index: {}]   ;;  %s100_s2 = inlined_call_operand.hbm [shape: f32[8,64], index: 2, kind: output, shape index: {}]  }
   0x1   :  { %v12_v0 = vld [vmem:[%s99_s1] sm:$0xff] }
   0x2   :  { %7 = vsyncpa [#allocation3], 0  ;;  %s63_s11 = smov 32   ;;  %vm17_vm0 = vcmask 261120   ;;  %v19_v1 = vld [vmem:[%s98_s0] sm:$0xff]  ;;  %s64_s14 = smov [#allocation2]  }
   0x3   :  { %14 = vrot.lane.b32.xlu0 %v12_v0, %s63_s11  ;;  %s29_s15 = sshll.u32 %s64_s14, 4  ;;  %vm21_vm1 = vcmask 523264   ;;  %s30_s15 = int_to_ptr.vmem [resolvable:$true] %s29_s15 }
   0x4   :  { %s39_s16 = scalar_lea.vmem %s30_s15, 128  ;;  %p44_p1 = scmp.lt.s32.totalorder %s30_s15, %s30_s15 }
   0x5   :  { %p40_p0 = scmp.ne.s32.totalorder %s30_s15, %s39_s16  ;;  %p45_p2 = scmp.lt.s32.totalorder %s39_s16, %s39_s16 }
   0x7   :  { %p46_p3 = por %p45_p2, %p44_p1 }
   0x9   :  { %p47_p4 = pnand %p46_p3, %p40_p0 }
  0x75   :  { %v15_v2 = vpop.permute.xlu0 %14 }
  0x76   :  { %v18_v3 = vsel %vm17_vm0, %v12_v0, %v15_v2 }
  0x77   :  { %v20_v4 = vadd.f32 %v19_v1, %v18_v3 }
  0x79   :  { %22 = vst.msk [vmem:[#allocation2] sm:$0xff] %vm21_vm1, %v20_v4 }
  0x7a   :  { %50 = shalt.err (!%p47_p4)
}
  0x7b   :  { %s51_s18 = scalar_lea.hbm %s100_s2, 128 }
  0x7c   :  { %p52_p5 = scmp.ne.s32.totalorder %s100_s2, %s51_s18  ;;  %p55_p6 = scmp.lt.u32.totalorder %s51_s18, %s100_s2 }
  0x7e   :  { %p57_p7 = pnand %p55_p6, %p52_p5 }
  0x80   :  { %60 = shalt.err (!%p57_p7)
}
  0x81   :  { %32 = dma.vmem_to_hbm [thread:$0]  %s30_s15, 128, %s100_s2, [#allocation3]  }
  0x82   :  { %61 = dma.done.wait [#allocation3], 128  }
  0x83   :  { %62 = vsyncadd [#allocation3], 4294967168 }
  0x84   :  { %36 = vsyncpa [#allocation3], 1 }

</bundles_post_ra>
